<compile_context>
chip_gen: v5e
topology: v5e:2x2
jax: 0.10.0
libtpu: 0.0.40
codegen_flags: <defaults>
</compile_context>

<pallas_src>
import math
import functools

import jax
import jax.numpy as jnp
from jax import lax
from jax.experimental import pallas as pl
from jax.experimental.pallas import tpu as pltpu

_INV_SQRT2 = 1.0 / math.sqrt(2.0)


def _round_up(a: int, b: int) -> int:
    return (a + b - 1) // b * b


def _ffn_kernel(x_ref, w1_ref, b1_ref, w2_ref, b2_ref, g_ref, beta_ref,
                o_ref, acc_ref, *, eps):
    j = pl.program_id(1)

    @pl.when(j == 0)
    def _():
        acc_ref[...] = jnp.zeros_like(acc_ref)

    # dense_1 slice: (TM, H) @ (H, TI) -> f32 accumulation on the MXU.
    # Operands stay in their stored dtype (bf16 weights hit the native bf16
    # MXU path); no in-kernel upcast of the weight tiles.
    x_mm = x_ref[...].astype(w1_ref.dtype)
    h = jnp.dot(x_mm, w1_ref[...], preferred_element_type=jnp.float32)
    h = h + b1_ref[...].astype(jnp.float32)

    # exact erf-GELU (matches the PyTorch module's gelu); constant multiply
    # by 1/sqrt(2) instead of a divide.
    h = h * 0.5 * (1.0 + lax.erf(h * _INV_SQRT2))

    # dense_2 partial product, accumulated across the I (intermediate) axis.
    acc_ref[...] += jnp.dot(h.astype(w2_ref.dtype), w2_ref[...],
                            preferred_element_type=jnp.float32)

    @pl.when(j == pl.num_programs(1) - 1)
    def _():
        # dropout: eval-mode identity (nn.Dropout is a no-op at inference)
        # TODO(synk): training-mode dropout (pltpu.prng_random_bits mask) not emitted.
        y = (acc_ref[...] + b2_ref[...].astype(jnp.float32)
             + x_ref[...].astype(jnp.float32))
        mean = jnp.mean(y, axis=-1, keepdims=True)
        var = jnp.mean((y - mean) * (y - mean), axis=-1, keepdims=True)
        y = (y - mean) * lax.rsqrt(var + eps)
        y = y * g_ref[...].astype(jnp.float32) + beta_ref[...].astype(jnp.float32)
        o_ref[...] = y.astype(o_ref.dtype)


def feed_forward(x, w1, b1, w2, b2, gamma, beta, *,
                 eps=1e-12, tile_m=256, tile_i=512):
    """x: [N, H]; w1: [H, I]; b1: [I]; w2: [I, H]; b2/gamma/beta: [H].
    Returns [N, H] in x.dtype.  Weights may be bf16 (f32 accumulation)."""
    N, H = x.shape
    I = w1.shape[1]
    assert w1.shape == (H, I) and w2.shape == (I, H)
    assert b1.shape == (I,) and b2.shape == (H,)
    assert gamma.shape == (H,) and beta.shape == (H,)
    # NOTE: keep H a multiple of 128 in deployed shapes (lane-dense stores).
    # H is not padded here because LayerNorm reduces over it.

    # ---- row tiling (parallel axis); pad N instead of asserting ----
    tile_m = max(8, _round_up(min(tile_m, _round_up(N, 8)), 8))
    n_pad = _round_up(N, tile_m)
    x_in = jnp.pad(x, ((0, n_pad - N), (0, 0))) if n_pad != N else x

    # ---- intermediate (I) tiling: trailing reduction axis ----
    if I <= tile_i:
        tile_i = I
        i_pad = I
    else:
        tile_i = _round_up(tile_i, 128)
        i_pad = _round_up(I, tile_i)
    if i_pad != I:
        # zero-padding I is exact: gelu(0 + 0) = 0 contributes nothing.
        w1 = jnp.pad(w1, ((0, 0), (0, i_pad - I)))
        b1 = jnp.pad(b1, ((0, i_pad - I),))
        w2 = jnp.pad(w2, ((0, i_pad - I), (0, 0)))

    b1_2d = b1.reshape(1, i_pad)
    b2_2d = b2.reshape(1, H)
    g_2d = gamma.reshape(1, H)
    beta_2d = beta.reshape(1, H)

    grid = (n_pad // tile_m, i_pad // tile_i)

    # ---- explicit scoped-VMEM budget (defaults are only 16/32 MiB) ----
    est = 2 * (tile_m * H * x_in.dtype.itemsize          # x tile (dbl-buffered)
               + H * tile_i * w1.dtype.itemsize          # w1 slice
               + tile_i * b1.dtype.itemsize              # b1 slice
               + tile_i * H * w2.dtype.itemsize          # w2 slice
               + 3 * H * 4                               # b2 / gamma / beta
               + tile_m * H * x_in.dtype.itemsize)       # out tile
    est += tile_m * H * 4                                # f32 accumulator
    est += tile_m * tile_i * 4                           # gelu intermediate
    vmem_limit = int(min(max(2 * est + (4 << 20), 8 << 20), 64 << 20))

    kernel = functools.partial(_ffn_kernel, eps=eps)

    out = pl.pallas_call(
        kernel,
        out_shape=jax.ShapeDtypeStruct((n_pad, H), x.dtype),
        grid_spec=pltpu.PrefetchScalarGridSpec(
            num_scalar_prefetch=0,
            grid=grid,
            in_specs=[
                pl.BlockSpec((tile_m, H), lambda i, j: (i, 0)),   # x rows
                pl.BlockSpec((H, tile_i), lambda i, j: (0, j)),   # w1 slice
                pl.BlockSpec((1, tile_i), lambda i, j: (0, j)),   # b1 slice
                pl.BlockSpec((tile_i, H), lambda i, j: (j, 0)),   # w2 slice
                pl.BlockSpec((1, H), lambda i, j: (0, 0)),        # b2
                pl.BlockSpec((1, H), lambda i, j: (0, 0)),        # gamma
                pl.BlockSpec((1, H), lambda i, j: (0, 0)),        # beta
            ],
            out_specs=pl.BlockSpec((tile_m, H), lambda i, j: (i, 0)),
            scratch_shapes=[pltpu.VMEM((tile_m, H), jnp.float32)],
        ),
        compiler_params=pltpu.CompilerParams(
            dimension_semantics=("parallel", "arbitrary"),
            vmem_limit_bytes=vmem_limit),
    )(x_in, w1, b1_2d, w2, b2_2d, g_2d, beta_2d)

    return out[:N] if n_pad != N else out


def feed_forward_ref(x, w1, b1, w2, b2, gamma, beta, eps=1e-12):
    """Pure-JAX reference matching the PyTorch forward (eval mode)."""
    h = x @ w1 + b1
    h = h * 0.5 * (1.0 + lax.erf(h / math.sqrt(2.0)))
    h = h @ w2 + b2
    y = h + x
    mean = jnp.mean(y, axis=-1, keepdims=True)
    var = jnp.mean((y - mean) ** 2, axis=-1, keepdims=True)
    y = (y - mean) / jnp.sqrt(var + eps)
    return y * gamma + beta


if __name__ == "__main__":
    eps = 1e-12
    root = jax.random.PRNGKey(0)

    def make_params(key, hidden, inner):
        k_w1, k_b1, k_w2, k_b2 = jax.random.split(key, 4)
        bound1 = 1.0 / math.sqrt(hidden)
        bound2 = 1.0 / math.sqrt(inner)
        w1 = jax.random.uniform(k_w1, (hidden, inner), jnp.float32, -bound1, bound1)
        b1 = jax.random.uniform(k_b1, (inner,), jnp.float32, -bound1, bound1)
        w2 = jax.random.uniform(k_w2, (inner, hidden), jnp.float32, -bound2, bound2)
        b2 = jax.random.uniform(k_b2, (hidden,), jnp.float32, -bound2, bound2)
        gamma = jnp.ones((hidden,), jnp.float32)   # LayerNorm init
        beta = jnp.zeros((hidden,), jnp.float32)
        return w1, b1, w2, b2, gamma, beta

    def run_check(key, batch, seq, hidden, inner, *, weight_dtype=jnp.float32,
                  tol=1e-5, **kw):
        k_x, k_p = jax.random.split(key)
        w1, b1, w2, b2, gamma, beta = make_params(k_p, hidden, inner)
        x = jax.random.normal(k_x, (batch, seq, hidden), jnp.float32)
        x2d = x.reshape(batch * seq, hidden)          # layout: [N, H]
        out = feed_forward(x2d, w1.astype(weight_dtype), b1,
                           w2.astype(weight_dtype), b2, gamma, beta,
                           eps=eps, **kw)
        out = jax.block_until_ready(out)
        ref = feed_forward_ref(x2d, w1, b1, w2, b2, gamma, beta, eps=eps)
        assert out.shape == (batch * seq, hidden)
        err = float(jnp.max(jnp.abs(out - ref)))
        assert jnp.allclose(out, ref, atol=tol, rtol=tol), f"mismatch: max abs err {err}"
        return out.reshape(batch, seq, hidden)        # back to (B, S, H)

    k1, k2, k3 = jax.random.split(root, 3)
    # 1) toy shape, f32 weights — exact-precision check.
    _ = run_check(k1, 2, 8, 32, 64, tol=1e-5)
    # 2) same shape, bf16 weights feeding the MXU directly (f32 accumulation).
    _ = run_check(k2, 2, 8, 32, 64, weight_dtype=jnp.bfloat16, tol=1e-1)
    # 3) lane-aligned shape exercising row padding + multi-step I reduction.
    _ = run_check(k3, 2, 50, 128, 512, tile_m=64, tile_i=128, tol=1e-4)

    print("KERNEL_OK")
</pallas_src>

<mosaic_0001>
module attributes {stable_mosaic.version = 11 : i64} {
  func.func @_ffn_kernel(%arg0: i32, %arg1: i32, %arg2: memref<16x32xf32, #tpu.memory_space<vmem>>, %arg3: memref<32x64xf32, #tpu.memory_space<vmem>>, %arg4: memref<1x64xf32, #tpu.memory_space<vmem>>, %arg5: memref<64x32xf32, #tpu.memory_space<vmem>>, %arg6: memref<1x32xf32, #tpu.memory_space<vmem>>, %arg7: memref<1x32xf32, #tpu.memory_space<vmem>>, %arg8: memref<1x32xf32, #tpu.memory_space<vmem>>, %arg9: memref<16x32xf32, #tpu.memory_space<vmem>>, %arg10: memref<16x32xf32, #tpu.memory_space<vmem>>) attributes {dimension_semantics = [#tpu.dimension_semantics<parallel>, #tpu.dimension_semantics<arbitrary>], iteration_bounds = array<i64: 1, 1>, scalar_prefetch = 0 : i64, scratch_operands = 1 : i64, tpu.core_type = #tpu.core_type<tc>, window_params = [{transform_indices = @transform_0, window_bounds = array<i64: 16, 32>}, {transform_indices = @transform_1, window_bounds = array<i64: 32, 64>}, {transform_indices = @transform_2, window_bounds = array<i64: 1, 64>}, {transform_indices = @transform_3, window_bounds = array<i64: 64, 32>}, {pipeline_mode = #tpu.pipeline_mode<synchronous>, transform_indices = @transform_4, window_bounds = array<i64: 1, 32>}, {pipeline_mode = #tpu.pipeline_mode<synchronous>, transform_indices = @transform_5, window_bounds = array<i64: 1, 32>}, {pipeline_mode = #tpu.pipeline_mode<synchronous>, transform_indices = @transform_6, window_bounds = array<i64: 1, 32>}, {transform_indices = @transform_7, window_bounds = array<i64: 16, 32>}]} {
    %c0_i32 = arith.constant 0 : i32
    %0 = arith.cmpi eq, %arg1, %c0_i32 : i32
    %1 = arith.extui %0 : i1 to i32
    %c0_i32_0 = arith.constant 0 : i32
    %2 = arith.cmpi ne, %1, %c0_i32_0 : i32
    scf.if %2 {
      %cst_18 = arith.constant 0.000000e+00 : f32
      %25 = vector.broadcast %cst_18 : f32 to vector<16x32xf32>
      %c0_19 = arith.constant 0 : index
      %c0_20 = arith.constant 0 : index
      %26 = vector.load %arg10[%c0_19, %c0_20] : memref<16x32xf32, #tpu.memory_space<vmem>>, vector<16x32xf32>
      tpu.vector_store %arg10[%c0_19, %c0_20], %25 {strides = array<i32>} : memref<16x32xf32, #tpu.memory_space<vmem>>, vector<16x32xf32>,
    } else {
    }
    %c0 = arith.constant 0 : index
    %c0_1 = arith.constant 0 : index
    %3 = vector.load %arg2[%c0, %c0_1] : memref<16x32xf32, #tpu.memory_space<vmem>>, vector<16x32xf32>
    %c0_2 = arith.constant 0 : index
    %c0_3 = arith.constant 0 : index
    %4 = vector.load %arg3[%c0_2, %c0_3] : memref<32x64xf32, #tpu.memory_space<vmem>>, vector<32x64xf32>
    %cst = arith.constant dense<0.000000e+00> : vector<16x64xf32>
    %5 = tpu.matmul %3, %4, %cst {dimension_numbers = #tpu.dot_dimension_numbers<[1], [0], [0], [1], [0, 0, 1, 1], [], []>} : vector<16x32xf32>, vector<32x64xf32>, vector<16x64xf32> -> vector<16x64xf32>
    %c0_4 = arith.constant 0 : index
    %c0_5 = arith.constant 0 : index
    %6 = vector.load %arg4[%c0_4, %c0_5] : memref<1x64xf32, #tpu.memory_space<vmem>>, vector<1x64xf32>
    %7 = vector.broadcast %6 : vector<1x64xf32> to vector<16x64xf32>
    %8 = arith.addf %5, %7 : vector<16x64xf32>
    %cst_6 = arith.constant 5.000000e-01 : f32
    %9 = vector.broadcast %cst_6 : f32 to vector<16x64xf32>
    %10 = arith.mulf %8, %9 : vector<16x64xf32>
    %cst_7 = arith.constant 0.707106769 : f32
    %11 = vector.broadcast %cst_7 : f32 to vector<16x64xf32>
    %12 = arith.mulf %8, %11 : vector<16x64xf32>
    %13 = math.erf %12 : vector<16x64xf32>
    %cst_8 = arith.constant 1.000000e+00 : f32
    %14 = vector.broadcast %cst_8 : f32 to vector<16x64xf32>
    %15 = arith.addf %14, %13 : vector<16x64xf32>
    %16 = arith.mulf %10, %15 : vector<16x64xf32>
    %c0_9 = arith.constant 0 : index
    %c0_10 = arith.constant 0 : index
    %17 = vector.load %arg10[%c0_9, %c0_10] : memref<16x32xf32, #tpu.memory_space<vmem>>, vector<16x32xf32>
    %c0_11 = arith.constant 0 : index
    %c0_12 = arith.constant 0 : index
    %18 = vector.load %arg5[%c0_11, %c0_12] : memref<64x32xf32, #tpu.memory_space<vmem>>, vector<64x32xf32>
    %cst_13 = arith.constant dense<0.000000e+00> : vector<16x32xf32>
    %19 = tpu.matmul %16, %18, %cst_13 {dimension_numbers = #tpu.dot_dimension_numbers<[1], [0], [0], [1], [0, 0, 1, 1], [], []>} : vector<16x64xf32>, vector<64x32xf32>, vector<16x32xf32> -> vector<16x32xf32>
    %20 = arith.addf %17, %19 : vector<16x32xf32>
    %c0_14 = arith.constant 0 : index
    %c0_15 = arith.constant 0 : index
    %21 = vector.load %arg10[%c0_14, %c0_15] : memref<16x32xf32, #tpu.memory_space<vmem>>, vector<16x32xf32>
    tpu.vector_store %arg10[%c0_14, %c0_15], %20 {strides = array<i32>} : memref<16x32xf32, #tpu.memory_space<vmem>>, vector<16x32xf32>,
    %c0_i32_16 = arith.constant 0 : i32
    %22 = arith.cmpi eq, %arg1, %c0_i32_16 : i32
    %23 = arith.extui %22 : i1 to i32
    %c0_i32_17 = arith.constant 0 : i32
    %24 = arith.cmpi ne, %23, %c0_i32_17 : i32
    scf.if %24 {
      %c0_18 = arith.constant 0 : index
      %c0_19 = arith.constant 0 : index
      %25 = vector.load %arg10[%c0_18, %c0_19] : memref<16x32xf32, #tpu.memory_space<vmem>>, vector<16x32xf32>
      %c0_20 = arith.constant 0 : index
      %c0_21 = arith.constant 0 : index
      %26 = vector.load %arg6[%c0_20, %c0_21] : memref<1x32xf32, #tpu.memory_space<vmem>>, vector<1x32xf32>
      %27 = vector.broadcast %26 : vector<1x32xf32> to vector<16x32xf32>
      %28 = arith.addf %25, %27 : vector<16x32xf32>
      %c0_22 = arith.constant 0 : index
      %c0_23 = arith.constant 0 : index
      %29 = vector.load %arg2[%c0_22, %c0_23] : memref<16x32xf32, #tpu.memory_space<vmem>>, vector<16x32xf32>
      %30 = arith.addf %28, %29 : vector<16x32xf32>
      %cst_24 = arith.constant dense<0.000000e+00> : vector<16xf32>
      %31 = vector.multi_reduction <add>, %30, %cst_24 [1] : vector<16x32xf32> to vector<16xf32>
      %32 = vector.shape_cast %31 : vector<16xf32> to vector<16x1xf32>
      %cst_25 = arith.constant 3.200000e+01 : f32
      %33 = vector.broadcast %cst_25 : f32 to vector<16x1xf32>
      %34 = arith.divf %32, %33 : vector<16x1xf32>
      %35 = vector.broadcast %34 : vector<16x1xf32> to vector<16x32xf32>
      %36 = arith.subf %30, %35 : vector<16x32xf32>
      %37 = vector.broadcast %34 : vector<16x1xf32> to vector<16x32xf32>
      %38 = arith.subf %30, %37 : vector<16x32xf32>
      %39 = arith.mulf %36, %38 : vector<16x32xf32>
      %cst_26 = arith.constant dense<0.000000e+00> : vector<16xf32>
      %40 = vector.multi_reduction <add>, %39, %cst_26 [1] : vector<16x32xf32> to vector<16xf32>
      %41 = vector.shape_cast %40 : vector<16xf32> to vector<16x1xf32>
      %cst_27 = arith.constant 3.200000e+01 : f32
      %42 = vector.broadcast %cst_27 : f32 to vector<16x1xf32>
      %43 = arith.divf %41, %42 : vector<16x1xf32>
      %44 = vector.broadcast %34 : vector<16x1xf32> to vector<16x32xf32>
      %45 = arith.subf %30, %44 : vector<16x32xf32>
      %cst_28 = arith.constant 9.99999996E-13 : f32
      %46 = vector.broadcast %cst_28 : f32 to vector<16x1xf32>
      %47 = arith.addf %43, %46 : vector<16x1xf32>
      %48 = math.rsqrt %47 : vector<16x1xf32>
      %49 = vector.broadcast %48 : vector<16x1xf32> to vector<16x32xf32>
      %50 = arith.mulf %45, %49 : vector<16x32xf32>
      %c0_29 = arith.constant 0 : index
      %c0_30 = arith.constant 0 : index
      %51 = vector.load %arg7[%c0_29, %c0_30] : memref<1x32xf32, #tpu.memory_space<vmem>>, vector<1x32xf32>
      %52 = vector.broadcast %51 : vector<1x32xf32> to vector<16x32xf32>
      %53 = arith.mulf %50, %52 : vector<16x32xf32>
      %c0_31 = arith.constant 0 : index
      %c0_32 = arith.constant 0 : index
      %54 = vector.load %arg8[%c0_31, %c0_32] : memref<1x32xf32, #tpu.memory_space<vmem>>, vector<1x32xf32>
      %55 = vector.broadcast %54 : vector<1x32xf32> to vector<16x32xf32>
      %56 = arith.addf %53, %55 : vector<16x32xf32>
      %c0_33 = arith.constant 0 : index
      %c0_34 = arith.constant 0 : index
      %57 = vector.load %arg9[%c0_33, %c0_34] : memref<16x32xf32, #tpu.memory_space<vmem>>, vector<16x32xf32>
      tpu.vector_store %arg9[%c0_33, %c0_34], %56 {strides = array<i32>} : memref<16x32xf32, #tpu.memory_space<vmem>>, vector<16x32xf32>,
    } else {
    }
    return
  }
  func.func @transform_0(%arg0: i32, %arg1: i32) -> (i32, i32) {
    %c0_i32 = arith.constant 0 : i32
    %c0_i32_0 = arith.constant 0 : i32
    return %arg0, %c0_i32 : i32, i32
  }
  func.func @transform_1(%arg0: i32, %arg1: i32) -> (i32, i32) {
    %c0_i32 = arith.constant 0 : i32
    %c0_i32_0 = arith.constant 0 : i32
    return %c0_i32, %arg1 : i32, i32
  }
  func.func @transform_2(%arg0: i32, %arg1: i32) -> (i32, i32) {
    %c0_i32 = arith.constant 0 : i32
    %c0_i32_0 = arith.constant 0 : i32
    return %c0_i32, %arg1 : i32, i32
  }
  func.func @transform_3(%arg0: i32, %arg1: i32) -> (i32, i32) {
    %c0_i32 = arith.constant 0 : i32
    %c0_i32_0 = arith.constant 0 : i32
    return %arg1, %c0_i32 : i32, i32
  }
  func.func @transform_4(%arg0: i32, %arg1: i32) -> (i32, i32) {
    %c0_i32 = arith.constant 0 : i32
    %c0_i32_0 = arith.constant 0 : i32
    %c0_i32_1 = arith.constant 0 : i32
    return %c0_i32, %c0_i32_0 : i32, i32
  }
  func.func @transform_5(%arg0: i32, %arg1: i32) -> (i32, i32) {
    %c0_i32 = arith.constant 0 : i32
    %c0_i32_0 = arith.constant 0 : i32
    %c0_i32_1 = arith.constant 0 : i32
    return %c0_i32, %c0_i32_0 : i32, i32
  }
  func.func @transform_6(%arg0: i32, %arg1: i32) -> (i32, i32) {
    %c0_i32 = arith.constant 0 : i32
    %c0_i32_0 = arith.constant 0 : i32
    %c0_i32_1 = arith.constant 0 : i32
    return %c0_i32, %c0_i32_0 : i32, i32
  }
  func.func @transform_7(%arg0: i32, %arg1: i32) -> (i32, i32) {
    %c0_i32 = arith.constant 0 : i32
    %c0_i32_0 = arith.constant 0 : i32
    return %arg0, %c0_i32 : i32, i32
  }
}

</mosaic_0001>

<bundles_post_ra>
// kernel: tpu_custom_call.1
= control target key start
LH: loop header
LB: loop body
LE: loop exit
PB: predicated region body
PF: predicated region fallthrough
CT: control target
= control target key end

     0   :  { %s531_s0 = inlined_call_operand.vmem [shape: f32[16,32], index: 0, kind: input, shape index: {}]   ;;  %s532_s1 = inlined_call_operand.vmem [shape: f32[32,64], index: 1, kind: input, shape index: {}]   ;;  %s533_s2 = inlined_call_operand.vmem [shape: f32[1,64], index: 2, kind: input, shape index: {}]   ;;  %s534_s3 = inlined_call_operand.vmem [shape: f32[64,32], index: 3, kind: input, shape index: {}]   ;;  %s535_s4 = inlined_call_operand.vmem [shape: f32[1,32], index: 4, kind: input, shape index: {}]   ;;  %s536_s5 = inlined_call_operand.vmem [shape: f32[1,32], index: 5, kind: input, shape index: {}]   ;;  %s537_s6 = inlined_call_operand.vmem [shape: f32[1,32], index: 6, kind: input, shape index: {}]   ;;  %s538_s7 = inlined_call_operand.hbm [shape: f32[16,32], index: 7, kind: output, shape index: {}]  }
   0x1   :  { %v39_v0 = vld [vmem:[%s532_s1 + $0x18] sm:$0xff]  ;;  %v38_v1 = vld [vmem:[%s532_s1 + $0x10] sm:$0xff]  ;;  %v37_v2 = vld [vmem:[%s532_s1 + $0x8] sm:$0xff] }
   0x2   :  { %63 = vmatpush.msra.mxu0 %v39_v0  ;;  %310 = vmatpush.msra.mxu3 %v39_v0 }
   0x4   :  { %64 = vmatpush.msra.mxu0 %v38_v1  ;;  %311 = vmatpush.msra.mxu3 %v38_v1 }
   0x5   :  { %12 = vsyncpa [#allocation4], 0  ;;  %v36_v3 = vld [vmem:[%s532_s1] sm:$0xff]  ;;  %vm31_vm0 = vcmask 261120   ;;  %v432_v5 = vld [vmem:[%s531_s0 + $0x8] sm:$0xff]  ;;  %v367_v56 = vmov 0.0  }
   0x6   :  { %65 = vmatpush.msra.mxu0 %v37_v2  ;;  %312 = vmatpush.msra.mxu3 %v37_v2  ;;  %v427_v4 = vld [vmem:[%s531_s0] sm:$0xff]  ;;  %v171_v14 = vld [vmem:[%s534_s3 + $0x38] sm:$0xff]  ;;  %v170_v18 = vld [vmem:[%s534_s3 + $0x30] sm:$0xff]  ;;  %32 = vst.msk [vmem:[#allocation2] sm:$0xff] %vm31_vm0, %v367_v56  ;;  %vm172_vm9 = vcmask 523264   ;;  %s370_s12 = smov 128  }
   0x7   :  { %v327_v6 = vld [vmem:[%s533_s2] ss:$0 sm:$0xff]  ;;  %187 = vmatpush.msra.mxu1 %v171_v14  ;;  %314 = vmatpush.msra.mxu2 %v171_v14  ;;  %v169_v22 = vld [vmem:[%s534_s3 + $0x28] sm:$0xff]  ;;  %v167_v31 = vld [vmem:[%s534_s3 + $0x18] sm:$0xff]  ;;  %33 = vst.msk [vmem:[#allocation2 + $0x8] sm:$0xff] %vm31_vm0, %v367_v56  ;;  %s371_s1 = smov 8  }
   0x8   :  { %66 = vmatpush.msra.mxu0 %v36_v3  ;;  %313 = vmatpush.msra.mxu3 %v36_v3  ;;  %v168_v26 = vld [vmem:[%s534_s3 + $0x20] sm:$0xff]  ;;  %v166_v35 = vld [vmem:[%s534_s3 + $0x10] sm:$0xff]  ;;  %v165_v40 = vld [vmem:[%s534_s3 + $0x8] sm:$0xff] }
   0x9   :  { %304 = vmatmul.msk.f32.vlgmr.msra.gmra.mxu0 %vm31_vm0, %v427_v4  ;;  %305 = vmatmul.msk.f32.vlgmr.msra.gmra.mxu3 %vm31_vm0, %v432_v5  ;;  %v164_v42 = vld [vmem:[%s534_s3] sm:$0xff] }
   0xa   :  { %188 = vmatpush.msra.mxu1 %v170_v18  ;;  %315 = vmatpush.msra.mxu2 %v170_v18 }
   0xc   :  { %189 = vmatpush.msra.mxu1 %v169_v22  ;;  %316 = vmatpush.msra.mxu2 %v169_v22 }
   0xe   :  { %190 = vmatpush.msra.mxu1 %v168_v26  ;;  %317 = vmatpush.msra.mxu2 %v168_v26 }
  0x10   :  { %191 = vmatpush.msra.mxu1 %v167_v31  ;;  %318 = vmatpush.msra.mxu2 %v167_v31 }
  0x12   :  { %192 = vmatpush.msra.mxu1 %v166_v35  ;;  %319 = vmatpush.msra.mxu2 %v166_v35 }
  0x14   :  { %193 = vmatpush.msra.mxu1 %v165_v40  ;;  %320 = vmatpush.msra.mxu2 %v165_v40 }
  0x16   :  { %194 = vmatpush.msra.mxu1 %v164_v42  ;;  %321 = vmatpush.msra.mxu2 %v164_v42  ;;  %v163_v42 = vld [vmem:[#allocation2 + $0x8] sm:$0xff] }
  0x86   :  { %v68_v7 = vpop.f32.mrf.mxu0 }
  0x87   :  { %v441_v8 = vadd.f32 %v327_v6, %v68_v7 }
  0x89   :  { %v444_v9 = vmul.f32 0.70710677, %v441_v8 }
  0x8b   :  { %v78_v10 = vmul.f32 %v444_v9, %v444_v9 }
  0x8c   :  { %v71_v11 = vpop.f32.mrf.mxu3 }
  0x8d   :  { %v448_v12 = vmin.f32 %v78_v10, 16.0  ;;  %v450_v13 = vadd.f32 %v327_v6, %v71_v11 }
  0x8f   :  { %v80_v15 = vmul.f32 2.1237322e-06, %v448_v12  ;;  %v91_v16 = vmul.f32 3.8918573e-05, %v448_v12  ;;  %v458_v17 = vmul.f32 0.70710677, %v450_v13 }
  0x91   :  { %v81_v19 = vadd.f32 0.00028619796, %v80_v15  ;;  %v92_v20 = vadd.f32 0.001143296, %v91_v16  ;;  %v118_v21 = vmul.f32 %v458_v17, %v458_v17 }
  0x93   :  { %v82_v23 = vmul.f32 %v81_v19, %v448_v12  ;;  %v93_v24 = vmul.f32 %v92_v20, %v448_v12  ;;  %v470_v25 = vmin.f32 %v118_v21, 16.0 }
  0x95   :  { %v83_v27 = vadd.f32 0.0036580483, %v82_v23  ;;  %v94_v28 = vadd.f32 0.014752088, %v93_v24  ;;  %v120_v29 = vmul.f32 2.1237322e-06, %v470_v25 }
  0x96   :  { %v131_v30 = vmul.f32 3.8918573e-05, %v470_v25 }
  0x97   :  { %v95_v32 = vmul.f32 %v94_v28, %v448_v12  ;;  %v121_v33 = vadd.f32 0.00028619796, %v120_v29  ;;  %v84_v37 = vmul.f32 %v83_v27, %v448_v12  ;;  %v74_v29 = vmul.f32 0.5, %v441_v8 }
  0x98   :  { %v132_v34 = vadd.f32 0.001143296, %v131_v30 }
  0x99   :  { %v96_v36 = vadd.f32 0.112945676, %v95_v32  ;;  %v122_v38 = vmul.f32 %v121_v33, %v470_v25  ;;  %v85_v46 = vadd.f32 0.05243302, %v84_v37 }
  0x9a   :  { %v133_v39 = vmul.f32 %v132_v34, %v470_v25 }
  0x9b   :  { %v97_v41 = vmul.f32 %v96_v36, %v448_v12  ;;  %v123_v45 = vadd.f32 0.0036580483, %v122_v38  ;;  %v86_v52 = vmul.f32 %v85_v46, %v448_v12  ;;  %v75_v36 = vmul.f32 0.5, %v450_v13 }
  0x9c   :  { %v134_v43 = vadd.f32 0.014752088, %v133_v39  ;;  %v162_v39 = vld [vmem:[#allocation2] sm:$0xff] }
  0x9d   :  { %v98_v44 = vadd.f32 0.4994258, %v97_v41  ;;  %v124_v51 = vmul.f32 %v123_v45, %v470_v25  ;;  %v87_v57 = vadd.f32 0.18741608, %v86_v52 }
  0x9e   :  { %v135_v47 = vmul.f32 %v134_v43, %v470_v25 }
  0x9f   :  { %v99_v48 = vmul.f32 %v98_v44, %v448_v12  ;;  %v125_v55 = vadd.f32 0.05243302, %v124_v51  ;;  %v88_v62 = vmul.f32 %v87_v57, %v448_v12  ;;  %v368_v51 = vmov 32.0  }
  0xa0   :  { %v136_v49 = vadd.f32 0.112945676, %v135_v47 }
  0xa1   :  { %v100_v50 = vadd.f32 1.0, %v99_v48  ;;  %v126_v61 = vmul.f32 %v125_v55, %v470_v25  ;;  %v89_v3 = vadd.f32 1.1283791, %v88_v62 }
  0xa2   :  { %v137_v53 = vmul.f32 %v136_v49, %v470_v25 }
  0xa3   :  { %331 = vrcp.f32 %v100_v50  ;;  %v112_v1 = vand.u32 2147483648, %v100_v50  ;;  %v127_v2 = vadd.f32 0.18741608, %v126_v61  ;;  %v110_v7 = vand.u32 2147483647, %v100_v50 }
  0xa4   :  { %v138_v54 = vadd.f32 0.4994258, %v137_v53  ;;  %vm106_vm2 = vweird.f32 %v100_v50  ;;  %v90_v18 = vmul.f32 %v89_v3, %v444_v9 }
  0xa5   :  { %v113_v14 = vor.u32 1.1754944e-38, %v112_v1  ;;  %v128_v15 = vmul.f32 %v127_v2, %v470_v25  ;;  %vm111_vm4 = vcmp.eq.f32.partialorder %v110_v7, 8.507059e+37 }
  0xa6   :  { %v139_v58 = vmul.f32 %v138_v54, %v470_v25 }
  0xa7   :  { %v129_v23 = vadd.f32 1.1283791, %v128_v15 }
  0xa8   :  { %v140_v59 = vadd.f32 1.0, %v139_v58 }
  0xa9   :  { %v332_v60 = vpop.eup %331  ;;  %v130_v9 = vmul.f32 %v129_v23, %v458_v17  ;;  %v328_v17 = vld [vmem:[%s535_s4] ss:$0 sm:$0xff] }
  0xaa   :  { %v102_v63 = vmul.f32 %v332_v60, %v100_v50  ;;  %333 = vrcp.f32 %v140_v59  ;;  %vm107_vm1 = vweird.f32 %v332_v60  ;;  %v152_v22 = vand.u32 2147483648, %v140_v59  ;;  %v330_v23 = vld [vmem:[%s537_s6] ss:$0 sm:$0xff]  ;;  %s292_s6 = sshll.u32 %s538_s7, 4  ;;  %s293_s6 = int_to_ptr.hbm [resolvable:$true] %s292_s6 }
  0xab   :  { %vm108_vm3 = vmor %vm106_vm2, %vm107_vm1  ;;  %v150_v26 = vand.u32 2147483647, %v140_v59  ;;  %vm146_vm6 = vweird.f32 %v140_v59  ;;  %335 = vrcp.f32 %v368_v51 }
  0xac   :  { %v103_v0 = vsub.f32 1.0, %v102_v63  ;;  %v153_v25 = vor.u32 1.1754944e-38, %v152_v22 }
  0xad   :  { %vm151_vm8 = vcmp.eq.f32.partialorder %v150_v26, 8.507059e+37 }
  0xae   :  { %v104_v6 = vmul.f32 %v332_v60, %v103_v0 }
  0xb0   :  { %v334_v10 = vpop.eup %333  ;;  %v105_v11 = vadd.f32 %v332_v60, %v104_v6 }
  0xb1   :  { %v142_v16 = vmul.f32 %v334_v10, %v140_v59  ;;  %vm147_vm5 = vweird.f32 %v334_v10  ;;  %v336_v52 = vpop.eup %335 }
  0xb2   :  { %v109_v12 = vsel %vm108_vm3, %v332_v60, %v105_v11  ;;  %vm148_vm7 = vmor %vm146_vm6, %vm147_vm5  ;;  %v228_v53 = vmul.f32 32.0, %v336_v52  ;;  %vm232_vm10 = vweird.f32 %v336_v52 }
  0xb3   :  { %v114_v19 = vsel %vm111_vm4, %v113_v14, %v109_v12  ;;  %v143_v20 = vsub.f32 1.0, %v142_v16 }
  0xb4   :  { %v115_v21 = vmul.f32 %v114_v19, %v90_v18  ;;  %v229_v54 = vsub.f32 1.0, %v228_v53 }
  0xb5   :  { %v144_v24 = vmul.f32 %v334_v10, %v143_v20  ;;  %v329_v20 = vld [vmem:[%s536_s5] ss:$0 sm:$0xff]  ;;  %s369_s5 = smov [#allocation3]  }
  0xb6   :  { %v306_v27 = vclamps-f32 %v115_v21, 1.0  ;;  %v230_v55 = vmul.f32 %v336_v52, %v229_v54  ;;  %s290_s9 = sshll.u32 %s369_s5, 4  ;;  %s291_s9 = int_to_ptr.vmem [resolvable:$true] %s290_s9 }
  0xb7   :  { %v145_v28 = vadd.f32 %v334_v10, %v144_v24 }
  0xb8   :  { %v158_v30 = vadd.f32 1.0, %v306_v27 }
  0xb9   :  { %v149_v31 = vsel %vm148_vm7, %v334_v10, %v145_v28 }
  0xba   :  { %v154_v32 = vsel %vm151_vm8, %v153_v25, %v149_v31  ;;  %v160_v33 = vmul.f32 %v158_v30, %v74_v29 }
  0xbb   :  { %v155_v34 = vmul.f32 %v154_v32, %v130_v9 }
  0xbc   :  { %308 = vmatmul.msk.f32.vlgmr.msra.gmra.mxu1 %vm172_vm9, %v160_v33 }
  0xbd   :  { %v307_v35 = vclamps-f32 %v155_v34, 1.0 }
  0xbf   :  { %v159_v37 = vadd.f32 1.0, %v307_v35 }
  0xc1   :  { %v161_v38 = vmul.f32 %v159_v37, %v75_v36 }
  0xc3   :  { %309 = vmatmul.msk.f32.vlgmr.msra.gmra.mxu2 %vm172_vm9, %v161_v38 }
 0x139   :  { %v196_v8 = vpop.f32.mrf.mxu1 }
 0x13a   :  { %v202_v40 = vadd.f32 %v196_v8, %v162_v39 }
 0x13c   :  { %204 = vst.msk [vmem:[#allocation2] sm:$0xff] %vm31_vm0, %v202_v40 }
 0x143   :  { %v209_v41 = vld [vmem:[#allocation2] sm:$0xff] }
 0x144   :  { %v215_v43 = vadd.f32 %v328_v17, %v209_v41 }
 0x146   :  { %v199_v44 = vpop.f32.mrf.mxu2  ;;  %v219_v45 = vadd.f32 %v215_v43, %v427_v4  ;;  %v231_v4 = vadd.f32 %v336_v52, %v230_v55 }
 0x147   :  { %v203_v46 = vadd.f32 %v199_v44, %v163_v42 }
 0x148   :  { %v221_v13 = vsel %vm31_vm0, %v219_v45, 0.0  ;;  %v233_v56 = vsel %vm232_vm10, %v336_v52, %v231_v4 }
 0x149   :  { %205 = vst.msk [vmem:[#allocation2 + $0x8] sm:$0xff] %vm31_vm0, %v203_v46  ;;  %222 = vadd.xlane.f32.xlu0 %v221_v13 }
 0x150   :  { %v210_v47 = vld [vmem:[#allocation2 + $0x8] sm:$0xff] }
 0x151   :  { %v216_v48 = vadd.f32 %v328_v17, %v210_v47 }
 0x153   :  { %v220_v49 = vadd.f32 %v216_v48, %v432_v5 }
 0x155   :  { %v224_v50 = vsel %vm31_vm0, %v220_v49, 0.0 }
 0x156   :  { %225 = vadd.xlane.f32.xlu0 %v224_v50 }
 0x1bc   :  { %v223_v57 = vpop.xlane.xlu0 %222 }
 0x1bd   :  { %v234_v58 = vmul.f32 %v233_v56, %v223_v57 }
 0x1bf   :  { %v236_v59 = vsub.f32 %v219_v45, %v234_v58 }
 0x1c1   :  { %v238_v60 = vmul.f32 %v236_v59, %v236_v59 }
 0x1c3   :  { %v240_v61 = vsel %vm31_vm0, %v238_v60, 0.0 }
 0x1c4   :  { %241 = vadd.xlane.f32.xlu1 %v240_v61 }
 0x1c9   :  { %v226_v5 = vpop.xlane.xlu0 %225 }
 0x1ca   :  { %v235_v62 = vmul.f32 %v233_v56, %v226_v5 }
 0x1cc   :  { %v237_v63 = vsub.f32 %v220_v49, %v235_v62 }
 0x1ce   :  { %v239_v0 = vmul.f32 %v237_v63, %v237_v63 }
 0x1d0   :  { %v243_v1 = vsel %vm31_vm0, %v239_v0, 0.0 }
 0x1d1   :  { %244 = vadd.xlane.f32.xlu1 %v243_v1 }
 0x237   :  { %v242_v2 = vpop.xlane.xlu1 %241 }
 0x238   :  { %v246_v3 = vmul.f32 %v242_v2, %v233_v56 }
 0x23a   :  { %v248_v6 = vadd.f32 1e-12, %v246_v3 }
 0x23c   :  { %337 = vrsqrt.f32 %v248_v6  ;;  %vm256_vm12 = vweird.f32 %v248_v6 }
 0x242   :  { %v338_v7 = vpop.eup %337 }
 0x243   :  { %v251_v10 = vmul.f32 %v338_v7, %v248_v6  ;;  %vm257_vm11 = vweird.f32 %v338_v7 }
 0x244   :  { %v245_v11 = vpop.xlane.xlu1 %244  ;;  %vm258_vm13 = vmor %vm256_vm12, %vm257_vm11 }
 0x245   :  { %v252_v14 = vmul.f32 %v338_v7, %v251_v10  ;;  %v247_v15 = vmul.f32 %v245_v11, %v233_v56 }
 0x247   :  { %v253_v16 = vmul.f32 0.5, %v252_v14  ;;  %v249_v18 = vadd.f32 1e-12, %v247_v15 }
 0x249   :  { %v254_v12 = vsub.f32 1.5, %v253_v16  ;;  %339 = vrsqrt.f32 %v249_v18  ;;  %vm266_vm15 = vweird.f32 %v249_v18 }
 0x24b   :  { %v255_v19 = vmul.f32 %v338_v7, %v254_v12 }
 0x24d   :  { %v259_v21 = vsel %vm258_vm13, %v338_v7, %v255_v19 }
 0x24e   :  { %v270_v22 = vmul.f32 %v259_v21, %v236_v59 }
 0x24f   :  { %v340_v24 = vpop.eup %339 }
 0x250   :  { %v276_v26 = vmul.f32 %v329_v20, %v270_v22  ;;  %v261_v27 = vmul.f32 %v340_v24, %v249_v18  ;;  %vm267_vm14 = vweird.f32 %v340_v24 }
 0x251   :  { %vm268_vm1 = vmor %vm266_vm15, %vm267_vm14 }
 0x252   :  { %v262_v28 = vmul.f32 %v340_v24, %v261_v27  ;;  %v282_v29 = vadd.f32 %v330_v23, %v276_v26 }
 0x254   :  { %v263_v25 = vmul.f32 0.5, %v262_v28  ;;  %284 = vst.msk [vmem:[#allocation3] sm:$0xff] %vm31_vm0, %v282_v29 }
 0x256   :  { %v264_v30 = vsub.f32 1.5, %v263_v25 }
 0x258   :  { %v265_v9 = vmul.f32 %v340_v24, %v264_v30 }
 0x25a   :  { %v269_v31 = vsel %vm268_vm1, %v340_v24, %v265_v9 }
 0x25b   :  { %v271_v32 = vmul.f32 %v269_v31, %v237_v63 }
 0x25d   :  { %v277_v33 = vmul.f32 %v329_v20, %v271_v32 }
 0x25f   :  { %v283_v34 = vadd.f32 %v330_v23, %v277_v33 }
 0x261   :  { %285 = vst.msk [vmem:[#allocation3 + $0x8] sm:$0xff] %vm31_vm0, %v283_v34 }
 0x262   :  { %298 = dma.vmem_to_hbm [thread:$0]  %s291_s9, 256, %s293_s6, [#allocation4], %s370_s12, %s370_s12, %s371_s1  }
 0x263   :  { %365 = dma.done.wait [#allocation4], 256  }
 0x264   :  { %366 = vsyncadd [#allocation4], 4294967040 }
 0x265   :  { %303 = vsyncpa [#allocation4], 1 }

</bundles_post_ra>
